<compile_context>
chip_gen: v7x
topology: tpu7x:2x2x1
jax: 0.10.0
libtpu: 0.0.40
codegen_flags: <defaults>
</compile_context>

<pallas_src>
import jax
import jax.numpy as jnp
from jax.experimental import pallas as pl
from jax.experimental.pallas import tpu as pltpu


# Per-buffer streaming-tile target.  in + out, double-buffered -> ~8 MiB of
# VMEM, which fits every generation's default scoped-VMEM budget.
_BLOCK_BUDGET_BYTES = 2 * 1024 * 1024


def _recurrent_dropout_kernel(x_ref, m_ref, o_ref):
    # x_ref: (bB, tT, C) [batch-first] or (tT, B, C) [time-first].
    # m_ref: same rank with a size-1 time axis, float32 -> broadcasts cleanly.
    # Multiply in f32 (mask dtype) and cast once on the store.
    o_ref[...] = (x_ref[...] * m_ref[...]).astype(o_ref.dtype)


def _fit_rows(want_rows: int, full: int) -> int:
    """Largest row count <= want_rows obeying the (8, x) sublane rule."""
    rows = min(max(want_rows, 1), full)
    if rows == full:
        return rows
    if rows >= 8:
        return (rows // 8) * 8
    return min(8, full)  # minimal legal tile when the budget is very tight


def recurrent_dropout(x, p: float, seed: int, *, batch_first: bool = False,
                      training: bool = True):
    """Pallas implementation of RecurrentDropout.forward."""
    # Matches the PyTorch module: eval mode, p <= 0 and p >= 1 are identity.
    if (not training) or p <= 0.0 or p >= 1.0:
        return x
    assert x.ndim == 3, "Input should be [B x T x C] or [T x B x C]"

    keep_p = 1.0 - p
    inv_keep = 1.0 / keep_p
    key = jax.random.PRNGKey(seed)
    dtype_bytes = jnp.dtype(x.dtype).itemsize

    if batch_first:
        B, T, C = x.shape
        # One Bernoulli(keep_p) draw per (batch, channel), shared across time
        # -- same shape as the module's x.new_empty(B, 1, C).bernoulli_().
        mask = (jax.random.bernoulli(key, keep_p, (B, 1, C))
                .astype(jnp.float32) * inv_keep)

        tT = _fit_rows(_BLOCK_BUDGET_BYTES // max(C * dtype_bytes, 1), T)
        # Small (T, C) slabs: pack several batch rows per grid step to
        # amortize the ~0.35 us per-grid-step overhead.
        bB = 1
        if tT == T:
            bB = max(1, min(B, _BLOCK_BUDGET_BYTES // max(T * C * dtype_bytes, 1)))
        grid = (pl.cdiv(B, bB), pl.cdiv(T, tT))

        in_specs = [
            pl.BlockSpec((bB, tT, C), lambda bi, ti: (bi, ti, 0)),
            pl.BlockSpec((bB, 1, C), lambda bi, ti: (bi, 0, 0)),
        ]
        out_spec = pl.BlockSpec((bB, tT, C), lambda bi, ti: (bi, ti, 0))
        dim_sem = ("parallel", "parallel")
    else:
        # Native [T, B, C] layout -- no transposes.
        T, B, C = x.shape
        mask = (jax.random.bernoulli(key, keep_p, (1, B, C))
                .astype(jnp.float32) * inv_keep)

        # TODO(synk): if B*C rows are themselves huge (>> budget), also tile B.
        tT = _fit_rows(_BLOCK_BUDGET_BYTES // max(B * C * dtype_bytes, 1), T)
        grid = (pl.cdiv(T, tT),)

        in_specs = [
            pl.BlockSpec((tT, B, C), lambda ti: (ti, 0, 0)),
            pl.BlockSpec((1, B, C), lambda ti: (0, 0, 0)),
        ]
        out_spec = pl.BlockSpec((tT, B, C), lambda ti: (ti, 0, 0))
        dim_sem = ("parallel",)

    return pl.pallas_call(
        _recurrent_dropout_kernel,
        out_shape=jax.ShapeDtypeStruct(x.shape, x.dtype),
        grid=grid,
        in_specs=in_specs,
        out_specs=out_spec,
        compiler_params=pltpu.CompilerParams(
            dimension_semantics=dim_sem,
            vmem_limit_bytes=32 * 1024 * 1024,
        ),
    )(x, mask)


if __name__ == "__main__":
    import numpy as np

    p = 0.5
    keep_p = 1.0 - p
    key = jax.random.PRNGKey(0)

    # --- batch-first path: [B, T, C] ---
    B, T, C = 2, 8, 128
    x_bf = jax.random.normal(key, (B, T, C), dtype=jnp.float32)
    out_bf = jax.block_until_ready(
        recurrent_dropout(x_bf, p, seed=1234, batch_first=True, training=True))

    ratio = np.asarray(out_bf) / np.asarray(x_bf)   # x ~ N(0,1), never exactly 0
    assert np.allclose(ratio, ratio[:, :1, :], atol=1e-5), \
        "mask must be shared across all time steps"
    vals = np.unique(np.round(ratio[:, 0, :], 4))
    assert set(vals.tolist()) <= {0.0, round(1.0 / keep_p, 4)}, \
        "mask values must be 0 or 1/keep_p"

    # --- time-first path (module default): [T, B, C] ---
    x_tf = jax.random.normal(jax.random.fold_in(key, 1), (T, B, C),
                             dtype=jnp.float32)
    out_tf = jax.block_until_ready(
        recurrent_dropout(x_tf, p, seed=7, batch_first=False, training=True))
    ratio_tf = np.asarray(out_tf) / np.asarray(x_tf)
    assert np.allclose(ratio_tf, ratio_tf[:1, :, :], atol=1e-5), \
        "mask must be shared across all time steps"

    # --- eval mode / degenerate p: identity passthrough ---
    out_eval = recurrent_dropout(x_bf, p, seed=1234, batch_first=True,
                                 training=False)
    assert np.array_equal(np.asarray(out_eval), np.asarray(x_bf))

    print("KERNEL_OK")
</pallas_src>

<mosaic_0001>
module attributes {stable_mosaic.version = 11 : i64} {
  func.func @_recurrent_dropout_kernel(%arg0: i32, %arg1: i32, %arg2: memref<2x8x128xf32, #tpu.memory_space<vmem>>, %arg3: memref<2x1x128xf32, #tpu.memory_space<vmem>>, %arg4: memref<2x8x128xf32, #tpu.memory_space<vmem>>) attributes {dimension_semantics = [#tpu.dimension_semantics<parallel>, #tpu.dimension_semantics<parallel>], iteration_bounds = array<i64: 1, 1>, scalar_prefetch = 0 : i64, scratch_operands = 0 : i64, tpu.core_type = #tpu.core_type<tc>, window_params = [{transform_indices = @transform_0, window_bounds = array<i64: 2, 8, 128>}, {transform_indices = @transform_1, window_bounds = array<i64: 2, 1, 128>}, {transform_indices = @transform_2, window_bounds = array<i64: 2, 8, 128>}]} {
    %c0 = arith.constant 0 : index
    %c0_0 = arith.constant 0 : index
    %c0_1 = arith.constant 0 : index
    %0 = vector.load %arg2[%c0, %c0_0, %c0_1] : memref<2x8x128xf32, #tpu.memory_space<vmem>>, vector<2x8x128xf32>
    %c0_2 = arith.constant 0 : index
    %c0_3 = arith.constant 0 : index
    %c0_4 = arith.constant 0 : index
    %1 = vector.load %arg3[%c0_2, %c0_3, %c0_4] : memref<2x1x128xf32, #tpu.memory_space<vmem>>, vector<2x1x128xf32>
    %2 = vector.broadcast %1 : vector<2x1x128xf32> to vector<2x8x128xf32>
    %3 = arith.mulf %0, %2 : vector<2x8x128xf32>
    %c0_5 = arith.constant 0 : index
    %c0_6 = arith.constant 0 : index
    %c0_7 = arith.constant 0 : index
    %4 = vector.load %arg4[%c0_5, %c0_6, %c0_7] : memref<2x8x128xf32, #tpu.memory_space<vmem>>, vector<2x8x128xf32>
    tpu.vector_store %arg4[%c0_5, %c0_6, %c0_7], %3 {strides = array<i32>} : memref<2x8x128xf32, #tpu.memory_space<vmem>>, vector<2x8x128xf32>,
    return
  }
  func.func @transform_0(%arg0: i32, %arg1: i32) -> (i32, i32, i32) {
    %c0_i32 = arith.constant 0 : i32
    %c0_i32_0 = arith.constant 0 : i32
    return %arg0, %arg1, %c0_i32 : i32, i32, i32
  }
  func.func @transform_1(%arg0: i32, %arg1: i32) -> (i32, i32, i32) {
    %c0_i32 = arith.constant 0 : i32
    %c0_i32_0 = arith.constant 0 : i32
    %c0_i32_1 = arith.constant 0 : i32
    return %arg0, %c0_i32, %c0_i32_0 : i32, i32, i32
  }
  func.func @transform_2(%arg0: i32, %arg1: i32) -> (i32, i32, i32) {
    %c0_i32 = arith.constant 0 : i32
    %c0_i32_0 = arith.constant 0 : i32
    return %arg0, %arg1, %c0_i32 : i32, i32, i32
  }
}

</mosaic_0001>

<bundles_post_ra>
// kernel: tpu_custom_call.1
= control target key start
LH: loop header
LB: loop body
LE: loop exit
PB: predicated region body
PF: predicated region fallthrough
CT: control target
= control target key end

     0   :  { %7 = vsyncpa [#allocation3], 0  ;;  %s172_s0 = inlined_call_operand.hbm [shape: f32[2,8,128], index: 0, kind: input, shape index: {}]   ;;  %s173_s1 = inlined_call_operand.vmem [shape: f32[2,1,128], index: 1, kind: input, shape index: {}]   ;;  %s174_s2 = inlined_call_operand.hbm [shape: f32[2,8,128], index: 2, kind: output, shape index: {}]  }
   0x1   :  { %8 = vsyncpa [#allocation4], 0  ;;  %s117_s9 = smov [#allocation2]   ;;  %s69_s13 = scalar_lea.hbm %s172_s0, 256 }
   0x2   :  { %s14_s10 = sshll.u32 %s117_s9, 4  ;;  %p70_p0 = scmp.ne.s32.totalorder %s172_s0, %s69_s13  ;;  %s15_s10 = int_to_ptr.vmem [resolvable:$true] %s14_s10 }
   0x3   :  { %p73_p1 = scmp.lt.u32.totalorder %s69_s13, %s172_s0 }
   0x5   :  { %p75_p2 = pnand %p73_p1, %p70_p0 }
   0x7   :  { %78 = shalt.err (!%p75_p2)
}
   0x8   :  { %s79_s18 = scalar_lea.vmem %s15_s10, 256  ;;  %p84_p4 = scmp.lt.s32.totalorder %s15_s10, %s15_s10 }
   0x9   :  { %p80_p3 = scmp.ne.s32.totalorder %s15_s10, %s79_s18  ;;  %p85_p5 = scmp.lt.s32.totalorder %s79_s18, %s79_s18 }
   0xb   :  { %p86_p6 = por %p85_p5, %p84_p4 }
   0xd   :  { %p87_p7 = pnand %p86_p6, %p80_p3 }
   0xf   :  { %90 = shalt.err (!%p87_p7)
}
  0x10   :  { %s118_s19 = smov 128   ;;  %s119_s20 = smov 8  }
  0x11   :  { %20 = dma.hbm_to_vmem [thread:$0]  %s172_s0, 256, %s15_s10, [#allocation3], %s118_s19, %s118_s19, %s119_s20  }
  0x12   :  { %113 = dma.done.wait [#allocation3], 256  }
  0x13   :  { %114 = vsyncadd [#allocation3], 4294967040  ;;  %s120_s23 = smov [#allocation5]   ;;  %v26_v0 = vld [vmem:[#allocation2] sm:$0xff]  ;;  %v27_v2 = vld [vmem:[#allocation2 + $0x8] sm:$0xff] }
  0x14   :  { %s51_s24 = sshll.u32 %s120_s23, 4  ;;  %v63_v1 = vld [vmem:[%s173_s1] ss:$0 sm:$0xff]  ;;  %v64_v4 = vld [vmem:[%s173_s1 + $0x1] ss:$0 sm:$0xff]  ;;  %s52_s24 = int_to_ptr.vmem [resolvable:$true] %s51_s24 }
  0x15   :  { %v42_v3 = vmul.f32 %v63_v1, %v26_v0  ;;  %v43_v5 = vmul.f32 %v64_v4, %v27_v2  ;;  %s91_s0 = scalar_lea.vmem %s52_s24, 256  ;;  %p96_p9 = scmp.lt.s32.totalorder %s52_s24, %s52_s24 }
  0x16   :  { %p92_p8 = scmp.ne.s32.totalorder %s52_s24, %s91_s0  ;;  %p97_p10 = scmp.lt.s32.totalorder %s91_s0, %s91_s0 }
  0x17   :  { %44 = vst [vmem:[#allocation5] sm:$0xff] %v42_v3  ;;  %45 = vst [vmem:[#allocation5 + $0x8] sm:$0xff] %v43_v5 }
  0x18   :  { %p98_p11 = por %p97_p10, %p96_p9 }
  0x1a   :  { %p99_p12 = pnand %p98_p11, %p92_p8 }
  0x1c   :  { %102 = shalt.err (!%p99_p12)
}
  0x1d   :  { %s103_s3 = scalar_lea.hbm %s174_s2, 256 }
  0x1e   :  { %p104_p13 = scmp.ne.s32.totalorder %s174_s2, %s103_s3  ;;  %p107_p0 = scmp.lt.u32.totalorder %s103_s3, %s174_s2 }
  0x20   :  { %p109_p1 = pnand %p107_p0, %p104_p13 }
  0x22   :  { %112 = shalt.err (!%p109_p1)
}
  0x23   :  { %57 = dma.vmem_to_hbm [thread:$0]  %s52_s24, 256, %s174_s2, [#allocation4], %s118_s19, %s118_s19, %s119_s20  }
  0x24   :  { %115 = dma.done.wait [#allocation4], 256  }
  0x25   :  { %116 = vsyncadd [#allocation4], 4294967040 }
  0x26   :  { %61 = vsyncpa [#allocation3], 1 }
  0x27   :  { %62 = vsyncpa [#allocation4], 1 }

</bundles_post_ra>
